<compile_context>
chip_gen: v5e
topology: v5e:2x2
jax: 0.10.0
libtpu: 0.0.40
codegen_flags: <defaults>
</compile_context>

<pallas_src>
import functools

import jax
import jax.numpy as jnp
from jax.experimental import pallas as pl
from jax.experimental.pallas import tpu as pltpu


_LANE = 128
_MAX_T_HW = 8192           # upper bound on spatial tile width (lanes)
_TILE_BYTES_BUDGET = 2 * 1024 * 1024   # ~2 MiB per input tile (x2 for double buffer)
_MXU_MIN_C = 128           # below this, unrolled VPU MACs beat a padded MXU matmul


def _avg_ckpt_kernel(x_ref, w_ref, b_ref, o_ref, *, inv_k, use_mxu):
    """One (batch, spatial-tile) grid step.

    x_ref: (1, C, T_HW) input tile (bf16 or f32)
    w_ref: (K, C)       ensemble 1x1-conv weights
    b_ref: (K, 1)       ensemble biases (f32)
    o_ref: (1, 1, T_HW) averaged-sigmoid output tile (f32)
    """
    x = x_ref[0]                      # (C, T_HW)
    w = w_ref[...]                    # (K, C)
    b = b_ref[...]                    # (K, 1) f32

    if use_mxu:
        # Real MXU-sized contraction: single matmul, f32 accumulation.
        logits = jnp.dot(w, x, preferred_element_type=jnp.float32) + b   # (K, T_HW)
    else:
        # K, C tiny (e.g. 3 x 4): a padded (K,C)@(C,T_HW) matmul would use <0.1%
        # of the MXU and pay the vmatmul push/pop; do K*C fused VPU MACs instead,
        # with the bias folded into the first MAC.
        xf = x.astype(jnp.float32)
        wf = w.astype(jnp.float32)
        c_dim = xf.shape[0]
        acc = wf[:, 0:1] * xf[0:1, :] + b                 # (K, T_HW)
        for c in range(1, c_dim):                         # unrolled at trace time
            acc = acc + wf[:, c:c + 1] * xf[c:c + 1, :]
        logits = acc

    # sigmoid via exp (EUP slot) + reciprocal; mean over K as sum * (1/K).
    probs = pl.reciprocal(1.0 + jnp.exp(-logits))         # (K, T_HW), f32, exact
    avg = jnp.sum(probs, axis=0, keepdims=True) * inv_k   # (1, T_HW)
    o_ref[0] = avg.astype(o_ref.dtype)


def _pick_spatial_tile(hw, c, compute_dtype):
    """Spatial tile width: multiple of 128, sized to ~2 MiB of input per tile."""
    bytes_per_elem = jnp.dtype(compute_dtype).itemsize
    budget_lanes = _TILE_BYTES_BUDGET // max(1, c * bytes_per_elem)
    t_hw = max(_LANE, min(_MAX_T_HW, budget_lanes))
    t_hw = (t_hw // _LANE) * _LANE
    hw_lane = -(-hw // _LANE) * _LANE
    return min(t_hw, hw_lane)


def average_checkpoints_forward(x_nchw, weights, biases, *,
                                compute_dtype=jnp.bfloat16):
    """x_nchw: [B, C, H, W]; weights: [K, C]; biases: [K].

    Returns [out] with out of shape [B, 1, H, W], matching the PyTorch
    module's `return [outputs.mean(dim=1, keepdim=True)]`.
    """
    B, C, H, W = x_nchw.shape
    K = weights.shape[0]
    HW = H * W

    t_hw = _pick_spatial_tile(HW, C, compute_dtype)
    hw_padded = -(-HW // t_hw) * t_hw

    x_flat = x_nchw.reshape(B, C, HW).astype(compute_dtype)
    if hw_padded != HW:
        x_flat = jnp.pad(x_flat, ((0, 0), (0, 0), (0, hw_padded - HW)))

    use_mxu = C >= _MXU_MIN_C
    # MXU path: bf16 weights feed the MXU directly; VPU MAC path: keep w in f32.
    w2d = weights.astype(compute_dtype if use_mxu else jnp.float32)
    b2d = biases.reshape(K, 1).astype(jnp.float32)

    kernel = functools.partial(_avg_ckpt_kernel,
                               inv_k=float(1.0 / K), use_mxu=use_mxu)

    # NOTE: output store is 1 sublane per tile but lane-dense (t_hw % 128 == 0);
    # output traffic is only 1/C of input traffic so the kernel is bound by the
    # input HBM read stream, which the 2-D parallel grid double-buffers.
    out_flat = pl.pallas_call(
        kernel,
        out_shape=jax.ShapeDtypeStruct((B, 1, hw_padded), jnp.float32),
        grid_spec=pltpu.PrefetchScalarGridSpec(
            num_scalar_prefetch=0,
            grid=(B, hw_padded // t_hw),
            in_specs=[
                pl.BlockSpec((1, C, t_hw), lambda b, s: (b, 0, s)),
                pl.BlockSpec((K, C), lambda b, s: (0, 0)),
                pl.BlockSpec((K, 1), lambda b, s: (0, 0)),
            ],
            out_specs=pl.BlockSpec((1, 1, t_hw), lambda b, s: (b, 0, s)),
        ),
        compiler_params=pltpu.CompilerParams(
            # Both axes independent -> both TCs get work on v7x megacore.
            dimension_semantics=("parallel", "parallel"),
            # Explicit budget sized for v7x's 64 MiB physical / 32 MiB scoped VMEM.
            vmem_limit_bytes=32 * 1024 * 1024,
        ),
    )(x_flat, w2d, b2d)

    out = out_flat[:, :, :HW].reshape(B, 1, H, W)
    return [out]


def _reference(x_nchw, weights, biases, compute_dtype):
    # Plain-JAX reference of the same synthetic ensemble (inputs rounded to
    # compute_dtype, math in f32 — mirrors the kernel's numerics).
    B, C, H, W = x_nchw.shape
    x = x_nchw.reshape(B, C, H * W).astype(compute_dtype).astype(jnp.float32)
    w = weights.astype(jnp.float32)
    logits = jnp.einsum("kc,bcs->bks", w, x) + biases[None, :, None].astype(jnp.float32)
    probs = jax.nn.sigmoid(logits)                       # [B, K, HW]
    return probs.mean(axis=1, keepdims=True).reshape(B, 1, H, W)


if __name__ == "__main__":
    key = jax.random.PRNGKey(0)
    kx, kw, kb = jax.random.split(key, 3)

    B, C, H, W = 2, 4, 16, 16     # small NCHW input
    K = 3                         # number of averaged checkpoints

    x = jax.random.normal(kx, (B, C, H, W), dtype=jnp.float32)
    # Deterministic synthetic "checkpoint" parameters for the 1x1-conv head.
    # TODO(synk): the real module deep-copies an arbitrary base model per
    # checkpoint; only this 1x1-conv head is synthesized here.
    weights = jax.random.normal(kw, (K, C), dtype=jnp.float32) * 0.5
    biases = jax.random.normal(kb, (K,), dtype=jnp.float32) * 0.1

    # f32 path: tight correctness check.
    out_f32 = average_checkpoints_forward(x, weights, biases,
                                          compute_dtype=jnp.float32)[0]
    out_f32 = jax.block_until_ready(out_f32)
    ref_f32 = _reference(x, weights, biases, jnp.float32)
    assert out_f32.shape == (B, 1, H, W), out_f32.shape
    assert jnp.allclose(out_f32, ref_f32, atol=1e-5, rtol=1e-5), \
        float(jnp.max(jnp.abs(out_f32 - ref_f32)))

    # bf16 path (default; halves HBM read traffic): compare against a
    # reference computed on the same bf16-rounded inputs.
    out_bf16 = average_checkpoints_forward(x, weights, biases)[0]
    out_bf16 = jax.block_until_ready(out_bf16)
    ref_bf16 = _reference(x, weights, biases, jnp.bfloat16)
    assert out_bf16.shape == (B, 1, H, W), out_bf16.shape
    assert jnp.allclose(out_bf16, ref_bf16, atol=1e-3, rtol=1e-3), \
        float(jnp.max(jnp.abs(out_bf16 - ref_bf16)))

    print("KERNEL_OK")
</pallas_src>

<mosaic_0001>
module attributes {stable_mosaic.version = 11 : i64} {
  func.func @_avg_ckpt_kernel(%arg0: i32, %arg1: i32, %arg2: memref<1x4x256xf32, #tpu.memory_space<vmem>>, %arg3: memref<3x4xf32, #tpu.memory_space<vmem>>, %arg4: memref<3x1xf32, #tpu.memory_space<vmem>>, %arg5: memref<1x1x256xf32, #tpu.memory_space<vmem>>) attributes {dimension_semantics = [#tpu.dimension_semantics<parallel>, #tpu.dimension_semantics<parallel>], iteration_bounds = array<i64: 2, 1>, scalar_prefetch = 0 : i64, scratch_operands = 0 : i64, tpu.core_type = #tpu.core_type<tc>, window_params = [{transform_indices = @transform_0, window_bounds = array<i64: 1, 4, 256>}, {pipeline_mode = #tpu.pipeline_mode<synchronous>, transform_indices = @transform_1, window_bounds = array<i64: 3, 4>}, {pipeline_mode = #tpu.pipeline_mode<synchronous>, transform_indices = @transform_2, window_bounds = array<i64: 3, 1>}, {transform_indices = @transform_3, window_bounds = array<i64: 1, 1, 256>}]} {
    %c0 = arith.constant 0 : index
    %c0_0 = arith.constant 0 : index
    %c0_1 = arith.constant 0 : index
    %0 = vector.load %arg2[%c0, %c0_0, %c0_1] : memref<1x4x256xf32, #tpu.memory_space<vmem>>, vector<1x4x256xf32>
    %1 = vector.shape_cast %0 : vector<1x4x256xf32> to vector<4x256xf32>
    %c0_2 = arith.constant 0 : index
    %c0_3 = arith.constant 0 : index
    %2 = vector.load %arg3[%c0_2, %c0_3] : memref<3x4xf32, #tpu.memory_space<vmem>>, vector<3x4xf32>
    %c0_4 = arith.constant 0 : index
    %c0_5 = arith.constant 0 : index
    %3 = vector.load %arg4[%c0_4, %c0_5] : memref<3x1xf32, #tpu.memory_space<vmem>>, vector<3x1xf32>
    %4 = vector.extract_strided_slice %2 {offsets = [0, 0], sizes = [3, 1], strides = [1, 1]} : vector<3x4xf32> to vector<3x1xf32>
    %5 = vector.extract_strided_slice %1 {offsets = [0, 0], sizes = [1, 256], strides = [1, 1]} : vector<4x256xf32> to vector<1x256xf32>
    %6 = vector.broadcast %4 : vector<3x1xf32> to vector<3x256xf32>
    %7 = vector.broadcast %5 : vector<1x256xf32> to vector<3x256xf32>
    %8 = arith.mulf %6, %7 : vector<3x256xf32>
    %9 = vector.broadcast %3 : vector<3x1xf32> to vector<3x256xf32>
    %10 = arith.addf %8, %9 : vector<3x256xf32>
    %11 = vector.extract_strided_slice %2 {offsets = [0, 1], sizes = [3, 1], strides = [1, 1]} : vector<3x4xf32> to vector<3x1xf32>
    %12 = vector.extract_strided_slice %1 {offsets = [1, 0], sizes = [1, 256], strides = [1, 1]} : vector<4x256xf32> to vector<1x256xf32>
    %13 = vector.broadcast %11 : vector<3x1xf32> to vector<3x256xf32>
    %14 = vector.broadcast %12 : vector<1x256xf32> to vector<3x256xf32>
    %15 = arith.mulf %13, %14 : vector<3x256xf32>
    %16 = arith.addf %10, %15 : vector<3x256xf32>
    %17 = vector.extract_strided_slice %2 {offsets = [0, 2], sizes = [3, 1], strides = [1, 1]} : vector<3x4xf32> to vector<3x1xf32>
    %18 = vector.extract_strided_slice %1 {offsets = [2, 0], sizes = [1, 256], strides = [1, 1]} : vector<4x256xf32> to vector<1x256xf32>
    %19 = vector.broadcast %17 : vector<3x1xf32> to vector<3x256xf32>
    %20 = vector.broadcast %18 : vector<1x256xf32> to vector<3x256xf32>
    %21 = arith.mulf %19, %20 : vector<3x256xf32>
    %22 = arith.addf %16, %21 : vector<3x256xf32>
    %23 = vector.extract_strided_slice %2 {offsets = [0, 3], sizes = [3, 1], strides = [1, 1]} : vector<3x4xf32> to vector<3x1xf32>
    %24 = vector.extract_strided_slice %1 {offsets = [3, 0], sizes = [1, 256], strides = [1, 1]} : vector<4x256xf32> to vector<1x256xf32>
    %25 = vector.broadcast %23 : vector<3x1xf32> to vector<3x256xf32>
    %26 = vector.broadcast %24 : vector<1x256xf32> to vector<3x256xf32>
    %27 = arith.mulf %25, %26 : vector<3x256xf32>
    %28 = arith.addf %22, %27 : vector<3x256xf32>
    %cst = arith.constant 0.000000e+00 : f32
    %29 = vector.broadcast %cst : f32 to vector<3x256xf32>
    %30 = arith.subf %29, %28 : vector<3x256xf32>
    %31 = math.exp %30 : vector<3x256xf32>
    %cst_6 = arith.constant 1.000000e+00 : f32
    %32 = vector.broadcast %cst_6 : f32 to vector<3x256xf32>
    %33 = arith.addf %32, %31 : vector<3x256xf32>
    %34 = tpu.reciprocal %33 : vector<3x256xf32> -> vector<3x256xf32>
    %cst_7 = arith.constant dense<0.000000e+00> : vector<256xf32>
    %35 = vector.multi_reduction <add>, %34, %cst_7 [0] : vector<3x256xf32> to vector<256xf32>
    %36 = vector.shape_cast %35 : vector<256xf32> to vector<1x256xf32>
    %cst_8 = arith.constant 0.333333343 : f32
    %37 = vector.broadcast %cst_8 : f32 to vector<1x256xf32>
    %38 = arith.mulf %36, %37 : vector<1x256xf32>
    %c0_9 = arith.constant 0 : index
    %c0_10 = arith.constant 0 : index
    %c0_11 = arith.constant 0 : index
    %39 = vector.load %arg5[%c0_9, %c0_10, %c0_11] : memref<1x1x256xf32, #tpu.memory_space<vmem>>, vector<1x1x256xf32>
    %40 = vector.shape_cast %39 : vector<1x1x256xf32> to vector<1x256xf32>
    %41 = vector.shape_cast %38 : vector<1x256xf32> to vector<1x1x256xf32>
    tpu.vector_store %arg5[%c0_9, %c0_10, %c0_11], %41 {strides = array<i32>} : memref<1x1x256xf32, #tpu.memory_space<vmem>>, vector<1x1x256xf32>,
    return
  }
  func.func @transform_0(%arg0: i32, %arg1: i32) -> (i32, i32, i32) {
    %c0_i32 = arith.constant 0 : i32
    %c0_i32_0 = arith.constant 0 : i32
    return %arg0, %c0_i32, %arg1 : i32, i32, i32
  }
  func.func @transform_1(%arg0: i32, %arg1: i32) -> (i32, i32) {
    %c0_i32 = arith.constant 0 : i32
    %c0_i32_0 = arith.constant 0 : i32
    %c0_i32_1 = arith.constant 0 : i32
    return %c0_i32, %c0_i32_0 : i32, i32
  }
  func.func @transform_2(%arg0: i32, %arg1: i32) -> (i32, i32) {
    %c0_i32 = arith.constant 0 : i32
    %c0_i32_0 = arith.constant 0 : i32
    %c0_i32_1 = arith.constant 0 : i32
    return %c0_i32, %c0_i32_0 : i32, i32
  }
  func.func @transform_3(%arg0: i32, %arg1: i32) -> (i32, i32, i32) {
    %c0_i32 = arith.constant 0 : i32
    %c0_i32_0 = arith.constant 0 : i32
    return %arg0, %c0_i32, %arg1 : i32, i32, i32
  }
}

</mosaic_0001>

<bundles_post_ra>
// kernel: tpu_custom_call.1
= control target key start
LH: loop header
LB: loop body
LE: loop exit
PB: predicated region body
PF: predicated region fallthrough
CT: control target
= control target key end

     0   :  { %8 = vsyncpa [#allocation3], 0  ;;  %s799_s0 = inlined_call_operand.hbm [shape: f32[2,4,256], index: 0, kind: input, shape index: {}]   ;;  %s800_s1 = inlined_call_operand.vmem [shape: f32[3,4], index: 1, kind: input, shape index: {}]   ;;  %s801_s2 = inlined_call_operand.vmem [shape: f32[3,1], index: 2, kind: input, shape index: {}]   ;;  %s802_s3 = inlined_call_operand.hbm [shape: f32[2,1,256], index: 3, kind: output, shape index: {}]  }
   0x1   :  { %10 = vsyncpa [#allocation3 + $0x1], 0 }
   0x2   :  { %11 = vsyncpa [#allocation4], 0 }
   0x3   :  { %13 = vsyncpa [#allocation4 + $0x1], 0  ;;  %s672_s12 = smov 0   ;;  %s674_s13 = smov 0  }
   0x4   :  { %s676_s14 = smov 0   ;;  %s678_s15 = smov 0  }
   0x5   :  { %s680_s16 = smov 0   ;;  %s682_s17 = smov 0  }
   0x6 LB: > { %s440_s18 = sadd.s32 4294967295, %s646_s17   ;;  %s441_s19 = sadd.s32 4294967294, %s646_s17   ;;  %s646_s17 = sphi %s682_s17, %s19_s17   ;;  %s642_s16 = sphi %s680_s16, %s811_s16   ;;  %s638_s15 = sphi %s678_s15, %s810_s15   ;;  %s634_s14 = sphi %s676_s14, %s809_s14   ;;  %s630_s13 = sphi %s674_s13, %s808_s13   ;;  %s626_s12 = sphi %s672_s12, %s807_s12  }
   0x7   : > { %s31_s20 = sadd.s32 1, %s642_s16  ;;  %s40_s21 = sadd.s32 1, %s634_s14 }
   0x8   : > { %p33_p0 = scmp.ge.s32.totalorder %s31_s20, 2  ;;  %p47_p1 = scmp.ne.s32.totalorder %s634_s14, %s630_s13 }
   0x9   : > { %p48_p2 = scmp.eq.s32.totalorder %s646_s17, 0  ;;  %p53_p3 = scmp.ne.s32.totalorder %s630_s13, %s626_s12 }
   0xa   : > { %s813_s20 = smov (%p33_p0, %s31_s20), 0  ;;  %p54_p5 = scmp.eq.s32.totalorder %s440_s18, 0 }
   0xb   : > { %p713_p4 = por %p48_p2, %p47_p1  ;;  %s35_s23 = ssub.s32 %s642_s16, %s813_s20 }
   0xc   : > { %p121_p6 = scmp.eq.s32.totalorder %s440_s18, 1  ;;  %p38_p7 = scmp.eq.s32.totalorder %s35_s23, 0 }
   0xd   : > { %p719_p8 = por %p54_p5, %p53_p3  ;;  %p127_p10 = scmp.eq.s32.totalorder %s441_s19, 1 }
   0xe   : > { %p723_p9 = por %p121_p6, %p47_p1  ;;  %p443_p12 = scmp.ge.s32.totalorder %s646_s17, 2 }
   0xf   : > { %s728_s26 = scalar_select %p38_p7, %s634_s14, %s40_s21  }
  0x10   : > { %p730_p11 = por %p127_p10, %p53_p3  ;;  %p467_p13 = scmp.lt.s32.totalorder %s646_s17, 2 }
  0x11   : > { %s153_s28 = sand.u32 1, %s634_s14   ;;  %s454_s30 = sshll.u32 %s642_s16, 3 }
  0x12   : > { %s444_s29 = sshll.u32 %s153_s28, 3  ;;  %s164_s6 = scalar_lea.hbm %s799_s0, %s454_s30 }
  0x13   : > { %s157_s7 = scalar_lea.vmem [#allocation2], %s444_s29  ;;  %s166_s9 = sshll.u32 %s164_s6, 4  ;;  %s167_s9 = int_to_ptr.hbm [resolvable:$true] %s166_s9 }
  0x14   : > { %s168_s8 = sshll.u32 %s157_s7, 4  ;;  %p460_p0 = pnand %p467_p13, %p713_p4  ;;  %s169_s8 = int_to_ptr.vmem [resolvable:$true] %s168_s8 }
  0x15   : > { %p447_p1 = scmp.ge.s32.totalorder %s646_s17, 1  ;;  %p173_p2 = scmp.lt.s32.totalorder %s646_s17, 3 }
  0x16   : > { %s154_s10 = scalar_lea.sflag [#allocation3], %s153_s28 }
  0x17   : > { %462 = dma.hbm_to_vmem [thread:$0]  (!%p460_p0), %s167_s9, 128, %s169_s8, %s154_s10  }
  0x18   : > { %p174_p3 = pnand %p447_p1, %p173_p2 }
  0x19   : > { %s746_s11 = sand.u32 (!%p174_p3), 1, %s630_s13  }
  0x1a   : > { %177 = sbr.rel (%p174_p3) target bundleno = 217 (0xd9), region = 32  ;;  %s448_s18 = sshll.u32 (!%p174_p3), %s746_s11, 3 }
  0x1b   : > { %s180_s19 = scalar_lea.sflag (!%p174_p3), [#allocation3], %s746_s11  ;;  %s183_s21 = scalar_lea.vmem (!%p174_p3), [#allocation2], %s448_s18 }
  0x1f   : > { %617 = dma.done.wait (%p719_p8), %s180_s19, 128  }
  0x20   : > { %619 = vsyncadd (%p719_p8), %s180_s19, 4294967168  ;;  %v648_v0 = vmov 0   ;;  %v649_v1 = vmov 1   ;;  %v650_v2 = vmov 3   ;;  %v210_v3 = vld [vmem:[%s800_s1] sm:$0x7] }
  0x21   : > { %521 = vset.pattern.permute.xlu0 %v648_v0  ;;  %522 = vset.pattern.permute.xlu1 %v649_v1  ;;  %v211_v4 = vld [vmem:[%s801_s2] sm:$0x7]  ;;  %v651_v5 = vmov 2   ;;  %vm311_vm5 = vcmask 1042432   ;;  %s449_s24 = sshll.u32 %s746_s11, 1  ;;  %s451_s30 = sshll.u32 %s638_s15, 1 }
  0x22   : > { %524 = vset.pattern.permute.xlu2 %v650_v2  ;;  %214 = vperm.xlu0 %521, %v210_v3   ;;  %v209_v6 = vld [vmem:[%s183_s21] sm:$0xff]  ;;  %s352_s6 = scalar_lea.hbm %s802_s3, %s451_s30  ;;  %s206_s7 = scalar_lea.vmem [#allocation5], %s449_s24  ;;  %vm331_vm9 = vcmask 1040384  }
  0x23   : > { %234 = vperm.xlu1 %522, %v210_v3   ;;  %262 = vperm.xlu2 %524, %v210_v3   ;;  %v218_v7 = vperm.slane %v209_v6, 0  ;;  %v219_v8 = vperm.slane %v209_v6, 4  ;;  %v237_v11 = vperm.slane %v209_v6, 1  ;;  %v238_v12 = vperm.slane %v209_v6, 5  ;;  %s354_s8 = sshll.u32 %s206_s7, 4  ;;  %s356_s9 = sshll.u32 %s352_s6, 4  ;;  %s355_s8 = int_to_ptr.vmem [resolvable:$true] %s354_s8  ;;  %s357_s9 = int_to_ptr.hbm [resolvable:$true] %s356_s9 }
  0x24   : > { %v251_v13 = vperm.slane %v209_v6, 2  ;;  %v252_v14 = vperm.slane %v209_v6, 6  ;;  %v265_v17 = vperm.slane %v209_v6, 3  ;;  %v266_v18 = vperm.slane %v209_v6, 7  ;;  %s340_s15 = scalar_lea.sflag [#allocation4], %s746_s11  ;;  %s578_s10 = sshra.s32 %s357_s9, 4  ;;  %s579_s10 = int_to_ptr.hbm [resolvable:$true] %s578_s10 }
  0x25   : > { %v222_v15 = vperm.slane %v218_v7, 0  ;;  %v223_v16 = vperm.slane %v219_v8, 0  ;;  %v241_v19 = vperm.slane %v237_v11, 1  ;;  %v242_v20 = vperm.slane %v238_v12, 1  ;;  %s580_s18 = scalar_lea.hbm %s579_s10, 2  ;;  %s584_s22 = scalar_lea.hbm %s802_s3, 4 }
  0x26   : > { %v255_v21 = vperm.slane %v251_v13, 2  ;;  %v256_v22 = vperm.slane %v252_v14, 2  ;;  %v269_v25 = vperm.slane %v265_v17, 3  ;;  %v270_v26 = vperm.slane %v266_v18, 3  ;;  %p581_p4 = scmp.ne.s32.totalorder %s579_s10, %s580_s18  ;;  %p585_p7 = scmp.lt.s32.totalorder %s579_s10, %s802_s3 }
  0x27   : > { %p586_p8 = scmp.lt.s32.totalorder %s584_s22, %s580_s18 }
  0x28   : > { %p582_p5 = pnand %p581_p4, %p723_p9 }
  0x29   : > { %p587_p10 = por %p586_p8, %p585_p7 }
  0x2a   : > { %228 = vperm.xlu0 %521, %v211_v4   ;;  %p583_p6 = pneg %p582_p5 }
  0x2b   : > { %523 = vset.pattern.permute.xlu1 %v651_v5 }
  0x2c   : > { %248 = vperm.xlu1 %523, %v210_v3   ;;  %p588_p13 = pnand %p587_p10, %p583_p6 }
  0x32   : > { %525 = vset.pattern.permute.xlu0 %v650_v2 }
  0x7d   : > { %v263_v28 = vpop.permute.xlu2 %262 }
  0x7e   : > { %v271_v38 = vmul.f32 %v269_v25, %v263_v28  ;;  %v272_v39 = vmul.f32 %v270_v26, %v263_v28 }
  0x94   : > { %v215_v9 = vpop.permute.xlu0 %214 }
  0x95   : > { %v235_v10 = vpop.permute.xlu1 %234  ;;  %v224_v23 = vmul.f32 %v222_v15, %v215_v9  ;;  %v225_v24 = vmul.f32 %v223_v16, %v215_v9 }
  0x96   : > { %v243_v29 = vmul.f32 %v241_v19, %v235_v10  ;;  %v244_v30 = vmul.f32 %v242_v20, %v235_v10 }
  0x9c   : > { %v229_v27 = vpop.permute.xlu0 %228 }
  0x9d   : > { %v231_v31 = vadd.f32 %v229_v27, %v224_v23  ;;  %v232_v32 = vadd.f32 %v229_v27, %v225_v24 }
  0x9e   : > { %v249_v33 = vpop.permute.xlu1 %248 }
  0x9f   : > { %v257_v34 = vmul.f32 %v255_v21, %v249_v33  ;;  %v258_v35 = vmul.f32 %v256_v22, %v249_v33  ;;  %v245_v36 = vadd.f32 %v243_v29, %v231_v31  ;;  %v246_v37 = vadd.f32 %v244_v30, %v232_v32 }
  0xa0   : > { %v334_v22 = vlaneseq }
  0xa1   : > { %v259_v40 = vadd.f32 %v257_v34, %v245_v36  ;;  %v260_v41 = vadd.f32 %v258_v35, %v246_v37 }
  0xa2   : > { %vm336_vm10 = vcmp.lt.s32.totalorder %v334_v22, 256 }
  0xa3   : > { %v273_v42 = vadd.f32 %v271_v38, %v259_v40  ;;  %v274_v43 = vadd.f32 %v272_v39, %v260_v41 }
  0xa5   : > { %v275_v44 = vsub.f32 0.0, %v273_v42  ;;  %v276_v45 = vsub.f32 0.0, %v274_v43 }
  0xa7   : > { %v277_v46 = vmul.f32 1.442695, %v275_v44  ;;  %v279_v47 = vmul.f32 1.442695, %v276_v45 }
  0xa9   : > { %526 = vpow2.f32 %v277_v46 }
  0xaa   : > { %528 = vpow2.f32 %v279_v47 }
  0xaf   : > { %v527_v48 = vpop.eup %526 }
  0xb0   : > { %v529_v49 = vpop.eup %528  ;;  %v281_v50 = vadd.f32 1.0, %v527_v48 }
  0xb1   : > { %v282_v51 = vadd.f32 1.0, %v529_v49 }
  0xb2   : > { %530 = vrcp.f32 %v281_v50  ;;  %v294_v57 = vand.u32 2147483648, %v281_v50  ;;  %v292_v60 = vand.u32 2147483647, %v281_v50  ;;  %vm288_vm2 = vweird.f32 %v281_v50 }
  0xb3   : > { %532 = vrcp.f32 %v282_v51  ;;  %v308_v61 = vand.u32 2147483648, %v282_v51  ;;  %v306_v63 = vand.u32 2147483647, %v282_v51  ;;  %vm302_vm4 = vweird.f32 %v282_v51 }
  0xb4   : > { %v295_v1 = vor.u32 1.1754944e-38, %v294_v57  ;;  %vm293_vm6 = vcmp.eq.f32.partialorder %v292_v60, 8.507059e+37 }
  0xb5   : > { %v309_v4 = vor.u32 1.1754944e-38, %v308_v61  ;;  %vm307_vm8 = vcmp.eq.f32.partialorder %v306_v63, 8.507059e+37 }
  0xb8   : > { %v531_v52 = vpop.eup %530 }
  0xb9   : > { %v533_v53 = vpop.eup %532  ;;  %v284_v54 = vmul.f32 %v531_v52, %v281_v50  ;;  %vm289_vm0 = vweird.f32 %v531_v52 }
  0xba   : > { %v298_v55 = vmul.f32 %v533_v53, %v282_v51  ;;  %vm303_vm1 = vweird.f32 %v533_v53  ;;  %vm290_vm3 = vmor %vm288_vm2, %vm289_vm0 }
  0xbb   : > { %v285_v56 = vsub.f32 1.0, %v284_v54  ;;  %vm304_vm7 = vmor %vm302_vm4, %vm303_vm1 }
  0xbc   : > { %v299_v58 = vsub.f32 1.0, %v298_v55 }
  0xbd   : > { %v286_v59 = vmul.f32 %v531_v52, %v285_v56 }
  0xbe   : > { %v300_v62 = vmul.f32 %v533_v53, %v299_v58 }
  0xbf   : > { %v287_v0 = vadd.f32 %v531_v52, %v286_v59 }
  0xc0   : > { %v301_v2 = vadd.f32 %v533_v53, %v300_v62 }
  0xc1   : > { %v291_v3 = vsel %vm290_vm3, %v531_v52, %v287_v0 }
  0xc2   : > { %v305_v5 = vsel %vm304_vm7, %v533_v53, %v301_v2  ;;  %v296_v6 = vsel %vm293_vm6, %v295_v1, %v291_v3 }
  0xc3   : > { %v310_v7 = vsel %vm307_vm8, %v309_v4, %v305_v5  ;;  %v312_v8 = vsel %vm311_vm5, %v296_v6, 0.0 }
  0xc4   : > { %v313_v9 = vrot.slane %v312_v8, 4  ;;  %v319_v10 = vsel %vm311_vm5, %v310_v7, 0.0 }
  0xc5   : > { %v320_v11 = vrot.slane %v319_v10, 4 }
  0xc6   : > { %v314_v12 = vadd.f32 %v313_v9, %v312_v8 }
  0xc7   : > { %v321_v13 = vadd.f32 %v320_v11, %v319_v10 }
  0xc8   : > { %v315_v14 = vrot.slane %v314_v12, 2 }
  0xc9   : > { %v322_v15 = vrot.slane %v321_v13, 2 }
  0xca   : > { %v316_v16 = vadd.f32 %v315_v14, %v314_v12 }
  0xcb   : > { %v323_v17 = vadd.f32 %v322_v15, %v321_v13 }
  0xcc   : > { %v317_v18 = vrot.slane %v316_v16, 1 }
  0xcd   : > { %v324_v19 = vrot.slane %v323_v17, 1 }
  0xce   : > { %v318_v20 = vadd.f32 %v317_v18, %v316_v16 }
  0xcf   : > { %v325_v21 = vadd.f32 %v324_v19, %v323_v17 }
  0xd0   : > { %v326_v24 = vmul.f32 0.33333334, %v318_v20 }
  0xd1   : > { %v327_v23 = vmul.f32 0.33333334, %v325_v21 }
  0xd3   : > { %v330_v25 = vrot.slane %v327_v23, 7 }
  0xd5   : > { %v332_v26 = vsel %vm331_vm9, %v326_v24, %v330_v25 }
  0xd6   : > { %338 = vst.msk [vmem:[%s206_s7] sm:$0x3] %vm336_vm10, %v332_v26 }
  0xd7   : > { %591 = shalt.err (!%p588_p13)
}
  0xd8   : > { %457 = dma.vmem_to_hbm [thread:$0]  (%p723_p9), %s355_s8, 32, %s357_s9, %s340_s15  }
  0xd9 PF: > { %s368_s11 = sand.u32 1, %s626_s12   ;;  %p464_p0 = pnand %p443_p12, %p730_p11 }
  0xda   : > { %s369_s29 = scalar_lea.sflag [#allocation4], %s368_s11 }
  0xdb   : > { %p465_p1 = pneg %p464_p0 }
  0xdd   : > { %621 = dma.done.wait (%p465_p1), %s369_s29, 32  }
  0xde   : > { %623 = vsyncadd (%p465_p1), %s369_s29, 4294967264  ;;  %s19_s17 = sadd.s32 1, %s646_s17   ;;  %s807_s12 = smov %s630_s13 }
  0xdf   : > { %p16_p2 = scmp.ge.s32.totalorder %s19_s17, 4   ;;  %s808_s13 = smov %s634_s14 }
  0xe0   : > { %s809_s14 = smov %s728_s26  ;;  %s810_s15 = smov %s642_s16 }
  0xe1   : > { %s811_s16 = smov %s813_s20  ;;  %18 = sbr.rel (!%p16_p2) target bundleno = 6 (0x6), region = 77 }
  0xe6   :  { %375 = vsyncpa [#allocation3], 1 }
  0xe7   :  { %377 = vsyncpa [#allocation3 + $0x1], 1 }
  0xe8   :  { %378 = vsyncpa [#allocation4], 1 }
  0xe9   :  { %380 = vsyncpa [#allocation4 + $0x1], 1 }

</bundles_post_ra>
